<compile_context>
chip_gen: v7x
topology: tpu7x:2x2x1
jax: 0.10.0
libtpu: 0.0.40
codegen_flags: <defaults>
</compile_context>

<pallas_src>
import jax
import jax.numpy as jnp
from jax import lax
from jax.experimental import pallas as pl
from jax.experimental.pallas import tpu as pltpu

NODES = 9                    # forward() reshapes features to (B*9, -1)
LANE = 128                   # TPU lane width
MAX_GRAPHS_PER_TILE = 256    # up to 256 graphs = 2304 node rows per grid step
RING_NORM = 0.5              # D^-1/2 A D^-1/2 of the 9-node ring (degree 2) = 0.5 * A


def _round_up(x, m):
    return (x + m - 1) // m * m


# ----------------------------- fused Pallas kernel ---------------------------

def _build_kernel(order, tb, d_model, d_pad):
    """Fused: `order` x (ring GraphConv + LayerNorm + ReLU), readout, Linear."""
    inv_d = 1.0 / float(d_model)
    eps = 1e-5

    def kernel(x_ref, *rest):
        *layer_refs, pw_ref, pb_ref, o_ref = rest

        # Node-major activations (NODES, tb, feat): the graph-structure op
        # (ring shift) is a cheap whole-slab copy along the leading axis and
        # (NODES, tb, d) <-> (NODES*tb, d) reshapes stay (8,128)-tile aligned
        # because tb is a multiple of 8.
        h = x_ref[...]                                    # (NODES, tb, f_pad) f32
        for l in range(order):
            w_ref, b_ref, g_ref, be_ref = layer_refs[4 * l: 4 * l + 4]

            # GraphConv aggregation on the fixed 9-node ring:
            #   (Ahat @ H)[i] = 0.5 * (H[(i-1)%9] + H[(i+1)%9]).
            # The 0.5 normalization is folded into W in the wrapper, so this is
            # two leading-axis shifts + one VPU add (no MXU / adjacency bcast).
            up = jnp.concatenate([h[1:], h[:1]], axis=0)
            down = jnp.concatenate([h[NODES - 1:], h[:NODES - 1]], axis=0)
            agg = up + down                               # (NODES, tb, K)

            # Projection: one wide MXU matmul over all NODES*tb node rows,
            # bf16 inputs, f32 accumulation.
            k_dim = agg.shape[-1]
            agg2 = agg.reshape(NODES * tb, k_dim).astype(jnp.bfloat16)
            hw = jnp.dot(agg2, w_ref[...],
                         preferred_element_type=jnp.float32) + b_ref[...]

            # LayerNorm (f32) + ReLU.  Unmasked statistics are exact because
            # lanes >= d_model of hw are exactly zero (zero-padded W columns /
            # bias), and zero-padded gamma/beta keep those output lanes zero.
            # Dropout(0.1) == identity in eval mode.
            mean = jnp.sum(hw, axis=-1, keepdims=True) * inv_d
            msq = jnp.sum(hw * hw, axis=-1, keepdims=True) * inv_d
            var = jnp.maximum(msq - mean * mean, 0.0)
            hn = (hw - mean) * lax.rsqrt(var + eps) * g_ref[...] + be_ref[...]
            h2 = jnp.maximum(hn, 0.0).astype(jnp.bfloat16)   # bf16 between layers
            h = h2.reshape(NODES, tb, d_pad)

        # Readout (node 0 of every graph) + Linear(d_model, 1) fused as a VPU
        # row-reduction; store lane-dense as a (1, 1, tb) slab.
        node0 = h[0].astype(jnp.float32)                  # (tb, d_pad)
        y = jnp.sum(node0 * pw_ref[...], axis=-1)          # (tb,)
        y = y.reshape(1, 1, tb) + pb_ref[...].reshape(1, 1, 1)
        o_ref[...] = y.astype(o_ref.dtype)

    return kernel


# ----------------------------- model wrapper ---------------------------------

def init_params(key, input_dim, d_model, order):
    """Logical (unpadded, f32) parameters matching the PyTorch module."""
    layers = []
    d_in = input_dim * 6
    for i in range(order):
        key, kw = jax.random.split(key)
        fan_in = d_in if i == 0 else d_model
        limit = (6.0 / (fan_in + d_model)) ** 0.5          # GraphConv xavier init
        w = jax.random.uniform(kw, (fan_in, d_model), jnp.float32, -limit, limit)
        b = jnp.zeros((d_model,), jnp.float32)
        gamma = jnp.ones((d_model,), jnp.float32)          # LayerNorm weight
        beta = jnp.zeros((d_model,), jnp.float32)          # LayerNorm bias
        layers.append((w, b, gamma, beta))
    key, kw, kb = jax.random.split(key, 3)
    lim = 1.0 / (d_model ** 0.5)
    pred_w = jax.random.uniform(kw, (d_model, 1), jnp.float32, -lim, lim)
    pred_b = jax.random.uniform(kb, (1,), jnp.float32, -lim, lim)
    return {"layers": layers, "pred_w": pred_w, "pred_b": pred_b}


def build_normalized_adj():
    """Shared 9-node bidirectional ring, symmetric-normalized (DGL GraphConv
    norm='both', no self loops).  Used by the dense reference only; the kernel
    hard-codes this topology (ring shifts, 0.5 folded into W)."""
    n = NODES
    idx = jnp.arange(n)
    a = jnp.zeros((n, n), jnp.float32)
    a = a.at[idx, (idx + 1) % n].set(1.0)
    a = a.at[(idx + 1) % n, idx].set(1.0)
    d_inv_sqrt = 1.0 / jnp.sqrt(a.sum(axis=1))
    return a * d_inv_sqrt[:, None] * d_inv_sqrt[None, :]


def gat_forward(params, features):
    """features: (B, 9, input_dim*6). Returns y: (B, 1)."""
    B, n_nodes, f_in = features.shape
    assert n_nodes == NODES, n_nodes
    order = len(params["layers"])
    d_model = params["layers"][0][0].shape[1]

    f_pad = _round_up(f_in, 32)      # small lane pad only (24->32): ~1.3x HBM read
    d_pad = _round_up(d_model, LANE)

    # >= 2 grid steps so v7x's 2 TensorCores both get work; tb multiple of 8
    # and sized to minimize padded graphs, capped for VMEM.
    num_tiles = max(2, pl.cdiv(B, MAX_GRAPHS_PER_TILE))
    tb = _round_up(pl.cdiv(B, num_tiles), 8)
    b_pad = tb * num_tiles

    # Node-major, graph-padded input in HBM (no 128-lane padding).
    x = jnp.zeros((NODES, b_pad, f_pad), jnp.float32)
    x = x.at[:, :B, :f_in].set(
        jnp.transpose(features, (1, 0, 2)).astype(jnp.float32))

    flat_params = []
    in_specs = [pl.BlockSpec((NODES, tb, f_pad), lambda i: (0, i, 0))]
    for l, (w, b, g, be) in enumerate(params["layers"]):
        din = w.shape[0]
        kp = f_pad if l == 0 else d_pad
        # Fold the ring's symmetric normalization (0.5, exact power of two)
        # into W.  Zero-padding of W columns / bias / gamma / beta beyond
        # d_model is the invariant the unmasked LayerNorm relies on.
        wp = jnp.zeros((kp, d_pad), jnp.bfloat16)
        wp = wp.at[:din, :d_model].set((RING_NORM * w).astype(jnp.bfloat16))
        bp = jnp.zeros((1, d_pad), jnp.float32).at[0, :d_model].set(b)
        gp = jnp.zeros((1, d_pad), jnp.float32).at[0, :d_model].set(g)
        bep = jnp.zeros((1, d_pad), jnp.float32).at[0, :d_model].set(be)
        flat_params += [wp, bp, gp, bep]
        in_specs += [
            pl.BlockSpec((kp, d_pad), lambda i: (0, 0)),
            pl.BlockSpec((1, d_pad), lambda i: (0, 0)),
            pl.BlockSpec((1, d_pad), lambda i: (0, 0)),
            pl.BlockSpec((1, d_pad), lambda i: (0, 0)),
        ]
    pw = jnp.zeros((1, d_pad), jnp.float32)
    pw = pw.at[0, :d_model].set(params["pred_w"][:, 0])
    pb = params["pred_b"].reshape(1, 1).astype(jnp.float32)
    flat_params += [pw, pb]
    in_specs += [pl.BlockSpec((1, d_pad), lambda i: (0, 0)),
                 pl.BlockSpec((1, 1), lambda i: (0, 0))]
    out_specs = pl.BlockSpec((1, 1, tb), lambda i: (i, 0, 0))

    # Advisory cost estimate so XLA schedules around the fused call.
    flops = 0
    for l in range(order):
        kp = f_pad if l == 0 else d_pad
        flops += NODES * b_pad * kp                       # ring aggregation adds
        flops += 2 * NODES * b_pad * kp * d_pad            # projection matmul
        flops += 10 * NODES * b_pad * d_pad                # LN + ReLU epilogue
    flops += 3 * b_pad * d_pad                             # readout + linear
    bytes_accessed = int(x.size) * 4 + b_pad * 4
    bytes_accessed += sum(int(a.size) * a.dtype.itemsize for a in flat_params)
    cost = pl.CostEstimate(flops=int(flops),
                           transcendentals=int(order * NODES * b_pad),
                           bytes_accessed=int(bytes_accessed))

    kernel = _build_kernel(order, tb, d_model, d_pad)

    y = pl.pallas_call(
        kernel,
        out_shape=jax.ShapeDtypeStruct((num_tiles, 1, tb), jnp.float32),
        grid_spec=pltpu.PrefetchScalarGridSpec(
            num_scalar_prefetch=0,
            grid=(num_tiles,),
            in_specs=in_specs,
            out_specs=out_specs,
        ),
        compiler_params=pltpu.CompilerParams(
            dimension_semantics=("parallel",),       # batch tiles split across TCs
            vmem_limit_bytes=32 * 1024 * 1024,       # explicit: safe on v5e..v7x
        ),
        cost_estimate=cost,
    )(x, *flat_params)

    return y.reshape(b_pad)[:B].reshape(B, 1)


# ----------------------------- pure-JAX reference ----------------------------

def gat_reference(params, adj9, features):
    """Dense f32 reference with the exact spec semantics (validation only)."""
    B = features.shape[0]
    h = features.reshape(B * NODES, -1).astype(jnp.float32)
    a_full = jnp.kron(jnp.eye(B, dtype=jnp.float32), adj9)
    for (w, b, g, be) in params["layers"]:
        h = a_full @ h @ w + b
        mu = h.mean(-1, keepdims=True)
        var = ((h - mu) ** 2).mean(-1, keepdims=True)
        h = (h - mu) * lax.rsqrt(var + 1e-5) * g + be
        h = jnp.maximum(h, 0.0)
    first = h[jnp.arange(B) * NODES]
    return first @ params["pred_w"] + params["pred_b"]


# --------------------------------- main ---------------------------------------

if __name__ == "__main__":
    input_dim = 4      # first-layer in_feats = input_dim * 6 = 24
    d_model = 32
    order = 2
    batch = 2

    key = jax.random.PRNGKey(0)
    key, kf, kp = jax.random.split(key, 3)
    features = jax.random.normal(kf, (batch, NODES, input_dim * 6), jnp.float32)
    params = init_params(kp, input_dim, d_model, order)

    fwd = jax.jit(gat_forward)
    y = jax.block_until_ready(fwd(params, features))

    assert y.shape == (batch, 1), y.shape
    assert bool(jnp.all(jnp.isfinite(y)))

    # Validate against the dense f32 reference (bf16 MXU tolerance).
    y_ref = gat_reference(params, build_normalized_adj(), features)
    err = float(jnp.max(jnp.abs(y - y_ref)))
    assert err < 0.25, f"mismatch vs reference: {err}"

    print("KERNEL_OK")
</pallas_src>

<mosaic_0001>
module attributes {stable_mosaic.version = 11 : i64} {
  func.func @kernel(%arg0: i32, %arg1: memref<9x8x32xf32, #tpu.memory_space<vmem>>, %arg2: memref<32x128xbf16, #tpu.memory_space<vmem>>, %arg3: memref<1x128xf32, #tpu.memory_space<vmem>>, %arg4: memref<1x128xf32, #tpu.memory_space<vmem>>, %arg5: memref<1x128xf32, #tpu.memory_space<vmem>>, %arg6: memref<128x128xbf16, #tpu.memory_space<vmem>>, %arg7: memref<1x128xf32, #tpu.memory_space<vmem>>, %arg8: memref<1x128xf32, #tpu.memory_space<vmem>>, %arg9: memref<1x128xf32, #tpu.memory_space<vmem>>, %arg10: memref<1x128xf32, #tpu.memory_space<vmem>>, %arg11: memref<1x1xf32, #tpu.memory_space<vmem>>, %arg12: memref<1x1x8xf32, #tpu.memory_space<vmem>>) attributes {dimension_semantics = [#tpu.dimension_semantics<parallel>], iteration_bounds = array<i64: 2>, scalar_prefetch = 0 : i64, scratch_operands = 0 : i64, tpu.core_type = #tpu.core_type<tc>, window_params = [{transform_indices = @transform_0, window_bounds = array<i64: 9, 8, 32>}, {pipeline_mode = #tpu.pipeline_mode<synchronous>, transform_indices = @transform_1, window_bounds = array<i64: 32, 128>}, {pipeline_mode = #tpu.pipeline_mode<synchronous>, transform_indices = @transform_2, window_bounds = array<i64: 1, 128>}, {pipeline_mode = #tpu.pipeline_mode<synchronous>, transform_indices = @transform_3, window_bounds = array<i64: 1, 128>}, {pipeline_mode = #tpu.pipeline_mode<synchronous>, transform_indices = @transform_4, window_bounds = array<i64: 1, 128>}, {pipeline_mode = #tpu.pipeline_mode<synchronous>, transform_indices = @transform_5, window_bounds = array<i64: 128, 128>}, {pipeline_mode = #tpu.pipeline_mode<synchronous>, transform_indices = @transform_6, window_bounds = array<i64: 1, 128>}, {pipeline_mode = #tpu.pipeline_mode<synchronous>, transform_indices = @transform_7, window_bounds = array<i64: 1, 128>}, {pipeline_mode = #tpu.pipeline_mode<synchronous>, transform_indices = @transform_8, window_bounds = array<i64: 1, 128>}, {pipeline_mode = #tpu.pipeline_mode<synchronous>, transform_indices = @transform_9, window_bounds = array<i64: 1, 128>}, {pipeline_mode = #tpu.pipeline_mode<synchronous>, transform_indices = @transform_10, window_bounds = array<i64: 1, 1>}, {transform_indices = @transform_11, window_bounds = array<i64: 1, 1, 8>}]} {
    %c0 = arith.constant 0 : index
    %c0_0 = arith.constant 0 : index
    %c0_1 = arith.constant 0 : index
    %0 = vector.load %arg1[%c0, %c0_0, %c0_1] : memref<9x8x32xf32, #tpu.memory_space<vmem>>, vector<9x8x32xf32>
    %1 = vector.extract_strided_slice %0 {offsets = [1, 0, 0], sizes = [8, 8, 32], strides = [1, 1, 1]} : vector<9x8x32xf32> to vector<8x8x32xf32>
    %2 = vector.extract_strided_slice %0 {offsets = [0, 0, 0], sizes = [1, 8, 32], strides = [1, 1, 1]} : vector<9x8x32xf32> to vector<1x8x32xf32>
    %3 = tpu.concatenate %1, %2 in 0 : vector<8x8x32xf32>, vector<1x8x32xf32> -> vector<9x8x32xf32>
    %4 = vector.extract_strided_slice %0 {offsets = [8, 0, 0], sizes = [1, 8, 32], strides = [1, 1, 1]} : vector<9x8x32xf32> to vector<1x8x32xf32>
    %5 = vector.extract_strided_slice %0 {offsets = [0, 0, 0], sizes = [8, 8, 32], strides = [1, 1, 1]} : vector<9x8x32xf32> to vector<8x8x32xf32>
    %6 = tpu.concatenate %4, %5 in 0 : vector<1x8x32xf32>, vector<8x8x32xf32> -> vector<9x8x32xf32>
    %7 = arith.addf %3, %6 : vector<9x8x32xf32>
    %8 = vector.shape_cast %7 : vector<9x8x32xf32> to vector<72x32xf32>
    %9 = arith.truncf %8 : vector<72x32xf32> to vector<72x32xbf16>
    %c0_2 = arith.constant 0 : index
    %c0_3 = arith.constant 0 : index
    %10 = vector.load %arg2[%c0_2, %c0_3] : memref<32x128xbf16, #tpu.memory_space<vmem>>, vector<32x128xbf16>
    %cst = arith.constant dense<0.000000e+00> : vector<72x128xf32>
    %11 = tpu.matmul %9, %10, %cst {dimension_numbers = #tpu.dot_dimension_numbers<[1], [0], [0], [1], [0, 0, 1, 1], [], []>} : vector<72x32xbf16>, vector<32x128xbf16>, vector<72x128xf32> -> vector<72x128xf32>
    %c0_4 = arith.constant 0 : index
    %c0_5 = arith.constant 0 : index
    %12 = vector.load %arg3[%c0_4, %c0_5] : memref<1x128xf32, #tpu.memory_space<vmem>>, vector<1x128xf32>
    %13 = vector.broadcast %12 : vector<1x128xf32> to vector<72x128xf32>
    %14 = arith.addf %11, %13 : vector<72x128xf32>
    %cst_6 = arith.constant dense<0.000000e+00> : vector<72xf32>
    %15 = vector.multi_reduction <add>, %14, %cst_6 [1] : vector<72x128xf32> to vector<72xf32>
    %16 = vector.shape_cast %15 : vector<72xf32> to vector<72x1xf32>
    %cst_7 = arith.constant 3.125000e-02 : f32
    %17 = vector.broadcast %cst_7 : f32 to vector<72x1xf32>
    %18 = arith.mulf %16, %17 : vector<72x1xf32>
    %19 = arith.mulf %14, %14 : vector<72x128xf32>
    %cst_8 = arith.constant dense<0.000000e+00> : vector<72xf32>
    %20 = vector.multi_reduction <add>, %19, %cst_8 [1] : vector<72x128xf32> to vector<72xf32>
    %21 = vector.shape_cast %20 : vector<72xf32> to vector<72x1xf32>
    %cst_9 = arith.constant 3.125000e-02 : f32
    %22 = vector.broadcast %cst_9 : f32 to vector<72x1xf32>
    %23 = arith.mulf %21, %22 : vector<72x1xf32>
    %24 = arith.mulf %18, %18 : vector<72x1xf32>
    %25 = arith.subf %23, %24 : vector<72x1xf32>
    %cst_10 = arith.constant 0.000000e+00 : f32
    %26 = vector.broadcast %cst_10 : f32 to vector<72x1xf32>
    %27 = arith.maximumf %25, %26 : vector<72x1xf32>
    %28 = vector.broadcast %18 : vector<72x1xf32> to vector<72x128xf32>
    %29 = arith.subf %14, %28 : vector<72x128xf32>
    %cst_11 = arith.constant 9.99999974E-6 : f32
    %30 = vector.broadcast %cst_11 : f32 to vector<72x1xf32>
    %31 = arith.addf %27, %30 : vector<72x1xf32>
    %32 = math.rsqrt %31 : vector<72x1xf32>
    %33 = vector.broadcast %32 : vector<72x1xf32> to vector<72x128xf32>
    %34 = arith.mulf %29, %33 : vector<72x128xf32>
    %c0_12 = arith.constant 0 : index
    %c0_13 = arith.constant 0 : index
    %35 = vector.load %arg4[%c0_12, %c0_13] : memref<1x128xf32, #tpu.memory_space<vmem>>, vector<1x128xf32>
    %36 = vector.broadcast %35 : vector<1x128xf32> to vector<72x128xf32>
    %37 = arith.mulf %34, %36 : vector<72x128xf32>
    %c0_14 = arith.constant 0 : index
    %c0_15 = arith.constant 0 : index
    %38 = vector.load %arg5[%c0_14, %c0_15] : memref<1x128xf32, #tpu.memory_space<vmem>>, vector<1x128xf32>
    %39 = vector.broadcast %38 : vector<1x128xf32> to vector<72x128xf32>
    %40 = arith.addf %37, %39 : vector<72x128xf32>
    %cst_16 = arith.constant 0.000000e+00 : f32
    %41 = vector.broadcast %cst_16 : f32 to vector<72x128xf32>
    %42 = arith.maximumf %40, %41 : vector<72x128xf32>
    %43 = arith.truncf %42 : vector<72x128xf32> to vector<72x128xbf16>
    %44 = vector.shape_cast %43 : vector<72x128xbf16> to vector<9x8x128xbf16>
    %45 = vector.extract_strided_slice %44 {offsets = [1, 0, 0], sizes = [8, 8, 128], strides = [1, 1, 1]} : vector<9x8x128xbf16> to vector<8x8x128xbf16>
    %46 = vector.extract_strided_slice %44 {offsets = [0, 0, 0], sizes = [1, 8, 128], strides = [1, 1, 1]} : vector<9x8x128xbf16> to vector<1x8x128xbf16>
    %47 = tpu.concatenate %45, %46 in 0 : vector<8x8x128xbf16>, vector<1x8x128xbf16> -> vector<9x8x128xbf16>
    %48 = vector.extract_strided_slice %44 {offsets = [8, 0, 0], sizes = [1, 8, 128], strides = [1, 1, 1]} : vector<9x8x128xbf16> to vector<1x8x128xbf16>
    %49 = vector.extract_strided_slice %44 {offsets = [0, 0, 0], sizes = [8, 8, 128], strides = [1, 1, 1]} : vector<9x8x128xbf16> to vector<8x8x128xbf16>
    %50 = tpu.concatenate %48, %49 in 0 : vector<1x8x128xbf16>, vector<8x8x128xbf16> -> vector<9x8x128xbf16>
    %51 = arith.addf %47, %50 : vector<9x8x128xbf16>
    %52 = vector.shape_cast %51 : vector<9x8x128xbf16> to vector<72x128xbf16>
    %c0_17 = arith.constant 0 : index
    %c0_18 = arith.constant 0 : index
    %53 = vector.load %arg6[%c0_17, %c0_18] : memref<128x128xbf16, #tpu.memory_space<vmem>>, vector<128x128xbf16>
    %cst_19 = arith.constant dense<0.000000e+00> : vector<72x128xf32>
    %54 = tpu.matmul %52, %53, %cst_19 {dimension_numbers = #tpu.dot_dimension_numbers<[1], [0], [0], [1], [0, 0, 1, 1], [], []>} : vector<72x128xbf16>, vector<128x128xbf16>, vector<72x128xf32> -> vector<72x128xf32>
    %c0_20 = arith.constant 0 : index
    %c0_21 = arith.constant 0 : index
    %55 = vector.load %arg7[%c0_20, %c0_21] : memref<1x128xf32, #tpu.memory_space<vmem>>, vector<1x128xf32>
    %56 = vector.broadcast %55 : vector<1x128xf32> to vector<72x128xf32>
    %57 = arith.addf %54, %56 : vector<72x128xf32>
    %cst_22 = arith.constant dense<0.000000e+00> : vector<72xf32>
    %58 = vector.multi_reduction <add>, %57, %cst_22 [1] : vector<72x128xf32> to vector<72xf32>
    %59 = vector.shape_cast %58 : vector<72xf32> to vector<72x1xf32>
    %cst_23 = arith.constant 3.125000e-02 : f32
    %60 = vector.broadcast %cst_23 : f32 to vector<72x1xf32>
    %61 = arith.mulf %59, %60 : vector<72x1xf32>
    %62 = arith.mulf %57, %57 : vector<72x128xf32>
    %cst_24 = arith.constant dense<0.000000e+00> : vector<72xf32>
    %63 = vector.multi_reduction <add>, %62, %cst_24 [1] : vector<72x128xf32> to vector<72xf32>
    %64 = vector.shape_cast %63 : vector<72xf32> to vector<72x1xf32>
    %cst_25 = arith.constant 3.125000e-02 : f32
    %65 = vector.broadcast %cst_25 : f32 to vector<72x1xf32>
    %66 = arith.mulf %64, %65 : vector<72x1xf32>
    %67 = arith.mulf %61, %61 : vector<72x1xf32>
    %68 = arith.subf %66, %67 : vector<72x1xf32>
    %cst_26 = arith.constant 0.000000e+00 : f32
    %69 = vector.broadcast %cst_26 : f32 to vector<72x1xf32>
    %70 = arith.maximumf %68, %69 : vector<72x1xf32>
    %71 = vector.broadcast %61 : vector<72x1xf32> to vector<72x128xf32>
    %72 = arith.subf %57, %71 : vector<72x128xf32>
    %cst_27 = arith.constant 9.99999974E-6 : f32
    %73 = vector.broadcast %cst_27 : f32 to vector<72x1xf32>
    %74 = arith.addf %70, %73 : vector<72x1xf32>
    %75 = math.rsqrt %74 : vector<72x1xf32>
    %76 = vector.broadcast %75 : vector<72x1xf32> to vector<72x128xf32>
    %77 = arith.mulf %72, %76 : vector<72x128xf32>
    %c0_28 = arith.constant 0 : index
    %c0_29 = arith.constant 0 : index
    %78 = vector.load %arg8[%c0_28, %c0_29] : memref<1x128xf32, #tpu.memory_space<vmem>>, vector<1x128xf32>
    %79 = vector.broadcast %78 : vector<1x128xf32> to vector<72x128xf32>
    %80 = arith.mulf %77, %79 : vector<72x128xf32>
    %c0_30 = arith.constant 0 : index
    %c0_31 = arith.constant 0 : index
    %81 = vector.load %arg9[%c0_30, %c0_31] : memref<1x128xf32, #tpu.memory_space<vmem>>, vector<1x128xf32>
    %82 = vector.broadcast %81 : vector<1x128xf32> to vector<72x128xf32>
    %83 = arith.addf %80, %82 : vector<72x128xf32>
    %cst_32 = arith.constant 0.000000e+00 : f32
    %84 = vector.broadcast %cst_32 : f32 to vector<72x128xf32>
    %85 = arith.maximumf %83, %84 : vector<72x128xf32>
    %86 = arith.truncf %85 : vector<72x128xf32> to vector<72x128xbf16>
    %87 = vector.shape_cast %86 : vector<72x128xbf16> to vector<9x8x128xbf16>
    %88 = vector.extract_strided_slice %87 {offsets = [0, 0, 0], sizes = [1, 8, 128], strides = [1, 1, 1]} : vector<9x8x128xbf16> to vector<1x8x128xbf16>
    %89 = vector.shape_cast %88 : vector<1x8x128xbf16> to vector<8x128xbf16>
    %90 = arith.extf %89 : vector<8x128xbf16> to vector<8x128xf32>
    %c0_33 = arith.constant 0 : index
    %c0_34 = arith.constant 0 : index
    %91 = vector.load %arg10[%c0_33, %c0_34] : memref<1x128xf32, #tpu.memory_space<vmem>>, vector<1x128xf32>
    %92 = vector.broadcast %91 : vector<1x128xf32> to vector<8x128xf32>
    %93 = arith.mulf %90, %92 : vector<8x128xf32>
    %cst_35 = arith.constant dense<0.000000e+00> : vector<8xf32>
    %94 = vector.multi_reduction <add>, %93, %cst_35 [1] : vector<8x128xf32> to vector<8xf32>
    %95 = vector.shape_cast %94 : vector<8xf32> to vector<1x1x8xf32>
    %c0_36 = arith.constant 0 : index
    %c0_37 = arith.constant 0 : index
    %96 = vector.load %arg11[%c0_36, %c0_37] : memref<1x1xf32, #tpu.memory_space<vmem>>, vector<1x1xf32>
    %97 = vector.shape_cast %96 : vector<1x1xf32> to vector<1x1x1xf32>
    %98 = vector.broadcast %97 : vector<1x1x1xf32> to vector<1x1x8xf32>
    %99 = arith.addf %95, %98 : vector<1x1x8xf32>
    %c0_38 = arith.constant 0 : index
    %c0_39 = arith.constant 0 : index
    %c0_40 = arith.constant 0 : index
    %100 = vector.load %arg12[%c0_38, %c0_39, %c0_40] : memref<1x1x8xf32, #tpu.memory_space<vmem>>, vector<1x1x8xf32>
    tpu.vector_store %arg12[%c0_38, %c0_39, %c0_40], %99 {strides = array<i32>} : memref<1x1x8xf32, #tpu.memory_space<vmem>>, vector<1x1x8xf32>,
    return
  }
  func.func @transform_0(%arg0: i32) -> (i32, i32, i32) {
    %c0_i32 = arith.constant 0 : i32
    %c0_i32_0 = arith.constant 0 : i32
    %c0_i32_1 = arith.constant 0 : i32
    return %c0_i32, %arg0, %c0_i32_0 : i32, i32, i32
  }
  func.func @transform_1(%arg0: i32) -> (i32, i32) {
    %c0_i32 = arith.constant 0 : i32
    %c0_i32_0 = arith.constant 0 : i32
    %c0_i32_1 = arith.constant 0 : i32
    return %c0_i32, %c0_i32_0 : i32, i32
  }
  func.func @transform_2(%arg0: i32) -> (i32, i32) {
    %c0_i32 = arith.constant 0 : i32
    %c0_i32_0 = arith.constant 0 : i32
    %c0_i32_1 = arith.constant 0 : i32
    return %c0_i32, %c0_i32_0 : i32, i32
  }
  func.func @transform_3(%arg0: i32) -> (i32, i32) {
    %c0_i32 = arith.constant 0 : i32
    %c0_i32_0 = arith.constant 0 : i32
    %c0_i32_1 = arith.constant 0 : i32
    return %c0_i32, %c0_i32_0 : i32, i32
  }
  func.func @transform_4(%arg0: i32) -> (i32, i32) {
    %c0_i32 = arith.constant 0 : i32
    %c0_i32_0 = arith.constant 0 : i32
    %c0_i32_1 = arith.constant 0 : i32
    return %c0_i32, %c0_i32_0 : i32, i32
  }
  func.func @transform_5(%arg0: i32) -> (i32, i32) {
    %c0_i32 = arith.constant 0 : i32
    %c0_i32_0 = arith.constant 0 : i32
    %c0_i32_1 = arith.constant 0 : i32
    return %c0_i32, %c0_i32_0 : i32, i32
  }
  func.func @transform_6(%arg0: i32) -> (i32, i32) {
    %c0_i32 = arith.constant 0 : i32
    %c0_i32_0 = arith.constant 0 : i32
    %c0_i32_1 = arith.constant 0 : i32
    return %c0_i32, %c0_i32_0 : i32, i32
  }
  func.func @transform_7(%arg0: i32) -> (i32, i32) {
    %c0_i32 = arith.constant 0 : i32
    %c0_i32_0 = arith.constant 0 : i32
    %c0_i32_1 = arith.constant 0 : i32
    return %c0_i32, %c0_i32_0 : i32, i32
  }
  func.func @transform_8(%arg0: i32) -> (i32, i32) {
    %c0_i32 = arith.constant 0 : i32
    %c0_i32_0 = arith.constant 0 : i32
    %c0_i32_1 = arith.constant 0 : i32
    return %c0_i32, %c0_i32_0 : i32, i32
  }
  func.func @transform_9(%arg0: i32) -> (i32, i32) {
    %c0_i32 = arith.constant 0 : i32
    %c0_i32_0 = arith.constant 0 : i32
    %c0_i32_1 = arith.constant 0 : i32
    return %c0_i32, %c0_i32_0 : i32, i32
  }
  func.func @transform_10(%arg0: i32) -> (i32, i32) {
    %c0_i32 = arith.constant 0 : i32
    %c0_i32_0 = arith.constant 0 : i32
    %c0_i32_1 = arith.constant 0 : i32
    return %c0_i32, %c0_i32_0 : i32, i32
  }
  func.func @transform_11(%arg0: i32) -> (i32, i32, i32) {
    %c0_i32 = arith.constant 0 : i32
    %c0_i32_0 = arith.constant 0 : i32
    %c0_i32_1 = arith.constant 0 : i32
    return %arg0, %c0_i32, %c0_i32_0 : i32, i32, i32
  }
}

</mosaic_0001>

<bundles_post_ra>
// kernel: gat_forward.1
= control target key start
LH: loop header
LB: loop body
LE: loop exit
PB: predicated region body
PF: predicated region fallthrough
CT: control target
= control target key end

     0   :  { %s1652_s0 = inlined_call_operand.vmem [shape: f32[9,16,32], index: 0, kind: input, shape index: {}]   ;;  %s1653_s1 = inlined_call_operand.vmem [shape: bf16[32,128], index: 1, kind: input, shape index: {}]   ;;  %s1654_s2 = inlined_call_operand.vmem [shape: f32[1,128], index: 2, kind: input, shape index: {}]   ;;  %s1655_s3 = inlined_call_operand.vmem [shape: f32[1,128], index: 3, kind: input, shape index: {}]   ;;  %s1656_s4 = inlined_call_operand.vmem [shape: f32[1,128], index: 4, kind: input, shape index: {}]   ;;  %s1657_s5 = inlined_call_operand.vmem [shape: bf16[128,128], index: 5, kind: input, shape index: {}]   ;;  %s1658_s6 = inlined_call_operand.vmem [shape: f32[1,128], index: 6, kind: input, shape index: {}]   ;;  %s1659_s7 = inlined_call_operand.vmem [shape: f32[1,128], index: 7, kind: input, shape index: {}]   ;;  %s1660_s8 = inlined_call_operand.vmem [shape: f32[1,128], index: 8, kind: input, shape index: {}]   ;;  %s1661_s9 = inlined_call_operand.vmem [shape: f32[1,128], index: 9, kind: input, shape index: {}]   ;;  %s1662_s10 = inlined_call_operand.<no memory space> [shape: f32[1,1], index: 10, kind: input, shape index: {}]   ;;  %s1663_s11 = inlined_call_operand.vmem [shape: f32[2,1,8], index: 11, kind: output, shape index: {}]  }
   0x1   :  { %v16_v0 = vstv %s1662_s10 }
   0x2   :  { %17 = vst [vmem:[#allocation2] sm:$0x1] %v16_v0 }
   0x3   :  { %s1403_s19 = smov 0   ;;  %s1405_s20 = smov 0  }
   0x4   :  { %s1407_s21 = smov 0  }
   0x5 LB: > { %s1101_s10 = sadd.s32 4294967295, %s1335_s21   ;;  %s1420_s22 = sadd.s32 1, %s1335_s21   ;;  %s1335_s21 = sphi %s1407_s21, %s1666_s21   ;;  %s1331_s20 = sphi %s1405_s20, %s1665_s20   ;;  %s1327_s19 = sphi %s1403_s19, %s1664_s19  }
   0x6   : > { %s27_s23 = ssub.s32 %s1335_s21, %s1420_s22  ;;  %s30_s24 = sadd.s32 1, %s1331_s20 }
   0x7   : > { %p28_p0 = scmp.eq.s32.totalorder %s27_s23, 0  ;;  %p37_p1 = scmp.ne.s32.totalorder %s1331_s20, %s1327_s19 }
   0x8   : > { %p38_p2 = scmp.eq.s32.totalorder %s1335_s21, 0  ;;  %p1104_p4 = scmp.ge.s32.totalorder %s1335_s21, 2 }
   0x9   : > { %s1429_s25 = scalar_select %p28_p0, %s1331_s20, %s30_s24  }
   0xa   : > { %p39_p3 = por %p38_p2, %p37_p1  ;;  %329 = sbr.rel (%p1104_p4) target bundleno = 26 (0x1a), region = 56 }
  0x11   : > { %332 = sbr.rel (!%p39_p3) target bundleno = 26 (0x1a), region = 60  ;;  %s334_s26 = sand.u32 (%p39_p3), 1, %s1331_s20  }
  0x12   : > { %s1105_s27 = sshll.u32 (%p39_p3), %s1335_s21, 3  ;;  %s1252_s28 = smul.u32 (%p39_p3), 72, %s334_s26 }
  0x13   : > { %s338_s12 = scalar_lea.vmem (%p39_p3), %s1652_s0, %s1105_s27 }
  0x14   : > { %v382_v1 = vld [vmem:[%s338_s12] sm:$0xff] (%p39_p3)  ;;  %v384_v2 = vld [vmem:[%s338_s12 + $0x10] sm:$0xff] (%p39_p3)  ;;  %s336_s13 = scalar_lea.vmem (%p39_p3), [#allocation3], %s1252_s28 }
  0x15   : > { %v386_v3 = vld [vmem:[%s338_s12 + $0x20] sm:$0xff] (%p39_p3)  ;;  %v388_v4 = vld [vmem:[%s338_s12 + $0x30] sm:$0xff] (%p39_p3)  ;;  %383 = vst [vmem:[%s336_s13] sm:$0xff] (%p39_p3), %v382_v1  ;;  %385 = vst [vmem:[%s336_s13 + $0x8] sm:$0xff] (%p39_p3), %v384_v2 }
  0x16   : > { %v390_v5 = vld [vmem:[%s338_s12 + $0x40] sm:$0xff] (%p39_p3)  ;;  %v392_v6 = vld [vmem:[%s338_s12 + $0x50] sm:$0xff] (%p39_p3)  ;;  %387 = vst [vmem:[%s336_s13 + $0x10] sm:$0xff] (%p39_p3), %v386_v3  ;;  %389 = vst [vmem:[%s336_s13 + $0x18] sm:$0xff] (%p39_p3), %v388_v4 }
  0x17   : > { %391 = vst [vmem:[%s336_s13 + $0x20] sm:$0xff] (%p39_p3), %v390_v5  ;;  %393 = vst [vmem:[%s336_s13 + $0x28] sm:$0xff] (%p39_p3), %v392_v6  ;;  %v394_v7 = vld [vmem:[%s338_s12 + $0x60] sm:$0xff] (%p39_p3)  ;;  %v396_v8 = vld [vmem:[%s338_s12 + $0x70] sm:$0xff] (%p39_p3) }
  0x18   : > { %v398_v9 = vld [vmem:[%s338_s12 + $0x80] sm:$0xff]  ;;  %395 = vst [vmem:[%s336_s13 + $0x30] sm:$0xff] %v394_v7  ;;  %397 = vst [vmem:[%s336_s13 + $0x38] sm:$0xff] %v396_v8 }
  0x19   : > { %399 = vst [vmem:[%s336_s13 + $0x40] sm:$0xff] %v398_v9 }
  0x1a PF: > { %p1106_p5 = scmp.ge.s32.totalorder %s1335_s21, 1  ;;  %p404_p6 = scmp.lt.s32.totalorder %s1335_s21, 3 }
  0x1c   : > { %p405_p7 = pnand %p1106_p5, %p404_p6 }
  0x1d   : > { %v1283_v10 = vld [vmem:[%s1653_s1] sm:$0xff] (!%p405_p7)   ;;  %v1337_v11 = vmov (!%p405_p7), 0.0   ;;  %v1284_v12 = vld [vmem:[%s1653_s1 + $0x8] sm:$0xff] (!%p405_p7)   ;;  %vm1338_vm0 = vmmov (!%p405_p7), 0   ;;  %s411_s18 = sand.u32 (!%p405_p7), 1, %s1327_s19   ;;  %vm498_vm1 = vcmask (!%p405_p7), 261120  }
  0x1e   : > { %408 = sbr.rel (%p405_p7) target bundleno = 1003 (0x3eb), region = 98  ;;  %1176 = vmatprep.subr.bf16.mxu0 (!%p405_p7), %v1337_v11  ;;  %1236 = vmatprep.subr.bf16.mxu1 (!%p405_p7), %v1337_v11  ;;  %v1107_v36 = vld [vmem:[%s1654_s2] ss:$0 sm:$0xff] (!%p405_p7)  ;;  %p448_p8 = scmp.lt.s32.totalorder (!%p405_p7), %s1101_s10, 1  ;;  %vm1046_vm2 = vcmask (!%p405_p7), 57344  }
  0x1f   : > { %1177 = vmatpush3.bf16.msra.mxu0 (!%p405_p7), %v1283_v10  ;;  %1180 = vmatprep.mubr.msk.bf16.mxu0 (!%p405_p7), %vm1338_vm0, %v1337_v11  ;;  %s1253_s23 = smul.u32 (!%p405_p7), 72, %s411_s18  ;;  %v1285_v10 = vld [vmem:[%s1657_s5] sm:$0xff] (!%p405_p7)  }
  0x20   : > { %1178 = vmatprep.subr.bf16.mxu0 (!%p405_p7), %v1337_v11  ;;  %1220 = vmatprep.mubr.msk.bf16.mxu1 (!%p405_p7), %vm1338_vm0, %v1337_v11 }
  0x21   : > { %s413_s24 = scalar_lea.vmem (!%p405_p7), [#allocation3], %s1253_s23  ;;  %1244 = vmatpush3.bf16.msra.mxu1 (!%p405_p7), %v1285_v10 }
  0x22   : > { %v452_v13 = vld [vmem:[%s413_s24] sm:$0xff] (!%p405_p7)  ;;  %v453_v14 = vld [vmem:[%s413_s24 + $0x8] sm:$0xff] (!%p405_p7)  ;;  %v454_v15 = vld [vmem:[%s413_s24 + $0x10] sm:$0xff] (!%p405_p7)  ;;  %1237 = vmatprep.subr.bf16.mxu1 (!%p405_p7), %v1337_v11 }
  0x23   : > { %1179 = vmatpush3.bf16.msra.mxu0 (!%p405_p7), %v1284_v12  ;;  %v460_v16 = vld [vmem:[%s413_s24 + $0x40] sm:$0xff] (!%p405_p7)  ;;  %v462_v17 = vadd.f32 (!%p405_p7), %v454_v15, %v452_v13  ;;  %v455_v19 = vld [vmem:[%s413_s24 + $0x18] sm:$0xff] (!%p405_p7)  ;;  %v457_v25 = vld [vmem:[%s413_s24 + $0x28] sm:$0xff] (!%p405_p7) }
  0x24   : > { %1200 = vmatprep.subr.bf16.mxu0 (!%p405_p7), %v1337_v11  ;;  %v461_v18 = vadd.f32 (!%p405_p7), %v460_v16, %v453_v14  ;;  %v456_v20 = vld [vmem:[%s413_s24 + $0x20] sm:$0xff] (!%p405_p7)  ;;  %v463_v22 = vadd.f32 (!%p405_p7), %v455_v19, %v453_v14  ;;  %v458_v26 = vld [vmem:[%s413_s24 + $0x30] sm:$0xff] (!%p405_p7)  ;;  %v465_v27 = vadd.f32 (!%p405_p7), %v457_v25, %v455_v19  ;;  %v459_v30 = vld [vmem:[%s413_s24 + $0x38] sm:$0xff] (!%p405_p7) }
  0x25   : > { %v464_v23 = vadd.f32 %v456_v20, %v454_v15  ;;  %v466_v28 = vadd.f32 %v458_v26, %v456_v20  ;;  %v467_v31 = vadd.f32 %v459_v30, %v457_v25  ;;  %v468_v32 = vadd.f32 %v460_v16, %v458_v26  ;;  %v1286_v12 = vld [vmem:[%s1657_s5 + $0x8] sm:$0xff]   ;;  %v1287_v14 = vld [vmem:[%s1657_s5 + $0x10] sm:$0xff]   ;;  %v1288_v15 = vld [vmem:[%s1657_s5 + $0x18] sm:$0xff]   ;;  %s1668_s10 = smov (!%p448_p8, %s1101_s10), 1 }
  0x26   : > { %v470_v21 = vpack.c.bf16 %v462_v17, %v461_v18  ;;  %v469_v34 = vadd.f32 %v459_v30, %v452_v13  ;;  %1245 = vmatpush3.bf16.msra.mxu1 %v1286_v12  ;;  %v1289_v16 = vld [vmem:[%s1657_s5 + $0x20] sm:$0xff]   ;;  %v1290_v17 = vld [vmem:[%s1657_s5 + $0x28] sm:$0xff]   ;;  %v1291_v18 = vld [vmem:[%s1657_s5 + $0x30] sm:$0xff]   ;;  %s450_s27 = scalar_lea.vmem %s1663_s11, %s1668_s10 }
  0x27   : > { %v471_v24 = vpack.c.bf16 %v464_v23, %v463_v22  ;;  %v472_v29 = vpack.c.bf16 %v466_v28, %v465_v27  ;;  %v473_v33 = vpack.c.bf16 %v468_v32, %v467_v31  ;;  %1238 = vmatprep.subr.bf16.mxu1 %v1337_v11  ;;  %v1292_v19 = vld [vmem:[%s1657_s5 + $0x38] sm:$0xff]  }
  0x28   : > { %1181 = vmatmul.mubr.msk.bf16.vlgmr.msra.gmra.mrb[0].mxu0 %vm498_vm1, %v470_v21  ;;  %v474_v35 = vpack.c.bf16 %v469_v34, %v469_v34 }
  0x29   : > { %1184 = vmatprep.mubr.msk.bf16.mxu0 %vm1338_vm0, %v1337_v11  ;;  %1201 = vmatpush3.bf16.msra.mxu0 %v1285_v10 }
  0x2a   : > { %1202 = vmatprep.subr.bf16.mxu0 %v1337_v11  ;;  %1246 = vmatpush3.bf16.msra.mxu1 %v1287_v14 }
  0x2b   : > { %1239 = vmatprep.subr.bf16.mxu1 %v1337_v11 }
  0x2d   : > { %1203 = vmatpush3.bf16.msra.mxu0 %v1286_v12 }
  0x2e   : > { %1204 = vmatprep.subr.bf16.mxu0 %v1337_v11  ;;  %1247 = vmatpush3.bf16.msra.mxu1 %v1288_v15 }
  0x2f   : > { %1240 = vmatprep.subr.bf16.mxu1 %v1337_v11 }
  0x30   : > { %1185 = vmatmul.mubr.msk.bf16.gmra.mrb[4].mxu0 %vm498_vm1, %v471_v24 }
  0x31   : > { %1188 = vmatprep.mubr.msk.bf16.mxu0 %vm1338_vm0, %v1337_v11  ;;  %1205 = vmatpush3.bf16.msra.mxu0 %v1287_v14 }
  0x32   : > { %1206 = vmatprep.subr.bf16.mxu0 %v1337_v11  ;;  %1248 = vmatpush3.bf16.msra.mxu1 %v1289_v16 }
  0x33   : > { %1241 = vmatprep.subr.bf16.mxu1 %v1337_v11 }
  0x35   : > { %1207 = vmatpush3.bf16.msra.mxu0 %v1288_v15 }
  0x36   : > { %1208 = vmatprep.subr.bf16.mxu0 %v1337_v11  ;;  %1249 = vmatpush3.bf16.msra.mxu1 %v1290_v17 }
  0x37   : > { %1242 = vmatprep.subr.bf16.mxu1 %v1337_v11 }
  0x38   : > { %1189 = vmatmul.mubr.msk.bf16.gmra.mrb[8].mxu0 %vm498_vm1, %v472_v29 }
  0x39   : > { %1192 = vmatprep.mubr.msk.bf16.mxu0 %vm1338_vm0, %v1337_v11  ;;  %1209 = vmatpush3.bf16.msra.mxu0 %v1289_v16 }
  0x3a   : > { %1210 = vmatprep.subr.bf16.mxu0 %v1337_v11  ;;  %1250 = vmatpush3.bf16.msra.mxu1 %v1291_v18 }
  0x3b   : > { %1243 = vmatprep.subr.bf16.mxu1 %v1337_v11 }
  0x3d   : > { %1211 = vmatpush3.bf16.msra.mxu0 %v1290_v17 }
  0x3e   : > { %1212 = vmatprep.subr.bf16.mxu0 %v1337_v11  ;;  %1251 = vmatpush3.bf16.msra.mxu1 %v1292_v19 }
  0x40   : > { %1193 = vmatmul.mubr.msk.bf16.gmra.mrb[12].mxu0 %vm498_vm1, %v473_v33 }
  0x41   : > { %1196 = vmatprep.mubr.msk.bf16.mxu0 %vm1338_vm0, %v1337_v11  ;;  %1213 = vmatpush3.bf16.msra.mxu0 %v1291_v18 }
  0x42   : > { %1214 = vmatprep.subr.bf16.mxu0 %v1337_v11 }
  0x45   : > { %1215 = vmatpush3.bf16.msra.mxu0 %v1292_v19 }
  0x48   : > { %1197 = vmatmul.mubr.msk.bf16.gmra.mrb[16].mxu0 %vm498_vm1, %v474_v35 }
  0x49   : > { %1216 = vmatprep.mubr.msk.bf16.mxu0 %vm1338_vm0, %v1337_v11 }
  0xfb   : > { %v548_v37 = vpop.f32.mrb[0].mxu0 }
  0xfc   : > { %v1472_v38 = vadd.f32 %v1107_v36, %v548_v37  ;;  %v1182_v39 = vpop.f32.mrb[1].mxu0 }
  0xfd   : > { %v551_v40 = vpop.f32.mrb[2].mxu0 }
  0xfe   : > { %v1474_v41 = vadd.f32 %v1107_v36, %v551_v40  ;;  %586 = vadd.xlane.f32.xlu0 %v1472_v38  ;;  %v1183_v42 = vpop.f32.mrb[3].mxu0  ;;  %v613_v47 = vmul.f32 %v1472_v38, %v1472_v38 }
 0x100   : > { %v614_v43 = vmul.f32 %v1474_v41, %v1474_v41 }
 0x102   : > { %588 = vadd.xlane.f32.xlu0 %v1474_v41  ;;  %624 = vadd.xlane.f32.xlu1 %v614_v43 }
 0x103   : > { %v556_v44 = vpop.f32.mrb[4].mxu0 }
 0x104   : > { %v1480_v45 = vadd.f32 %v1107_v36, %v556_v44  ;;  %v1186_v46 = vpop.f32.mrb[5].mxu0 }
 0x105   : > { %v559_v48 = vpop.f32.mrb[6].mxu0 }
 0x106   : > { %622 = vadd.xlane.f32.xlu0 %v613_v47  ;;  %590 = vadd.xlane.f32.xlu1 %v1480_v45  ;;  %v1187_v49 = vpop.f32.mrb[7].mxu0  ;;  %v615_v50 = vmul.f32 %v1480_v45, %v1480_v45  ;;  %v1487_v52 = vadd.f32 %v1107_v36, %v559_v48 }
 0x108   : > { %v616_v56 = vmul.f32 %v1487_v52, %v1487_v52 }
 0x10a   : > { %626 = vadd.xlane.f32.xlu0 %v615_v50 }
 0x10b   : > { %v564_v51 = vpop.f32.mrb[8].mxu0 }
 0x10c   : > { %v1190_v53 = vpop.f32.mrb[9].mxu0  ;;  %v1505_v6 = vadd.f32 %v1107_v36, %v564_v51 }
 0x10d   : > { %v567_v54 = vpop.f32.mrb[10].mxu0 }
 0x10e   : > { %592 = vadd.xlane.f32.xlu0 %v1487_v52  ;;  %v1191_v55 = vpop.f32.mrb[11].mxu0  ;;  %v1492_v58 = vadd.f32 %v1107_v36, %v567_v54  ;;  %v617_v7 = vmul.f32 %v1505_v6, %v1505_v6 }
 0x110   : > { %v618_v62 = vmul.f32 %v1492_v58, %v1492_v58 }
 0x112   : > { %628 = vadd.xlane.f32.xlu0 %v616_v56 }
 0x113   : > { %v572_v57 = vpop.f32.mrb[12].mxu0 }
 0x114   : > { %v1194_v59 = vpop.f32.mrb[13].mxu0  ;;  %v1510_v8 = vadd.f32 %v1107_v36, %v572_v57 }
 0x115   : > { %v575_v60 = vpop.f32.mrb[14].mxu0 }
 0x116   : > { %596 = vadd.xlane.f32.xlu0 %v1492_v58  ;;  %v1195_v61 = vpop.f32.mrb[15].mxu0  ;;  %v1497_v0 = vadd.f32 %v1107_v36, %v575_v60  ;;  %v619_v9 = vmul.f32 %v1510_v8, %v1510_v8 }
 0x118   : > { %v620_v13 = vmul.f32 %v1497_v0, %v1497_v0 }
 0x11a   : > { %632 = vadd.xlane.f32.xlu0 %v618_v62 }
 0x11b   : > { %v580_v63 = vpop.f32.mrb[16].mxu0 }
 0x11c   : > { %v1499_v1 = vadd.f32 %v1107_v36, %v580_v63  ;;  %v1198_v2 = vpop.f32.mrb[17].mxu0 }
 0x11d   : > { %v583_v3 = vpop.f32.mrb[18].mxu0 }
 0x11e   : > { %600 = vadd.xlane.f32.xlu0 %v1497_v0  ;;  %602 = vadd.xlane.f32.xlu1 %v1499_v1  ;;  %v1199_v4 = vpop.f32.mrb[19].mxu0  ;;  %v621_v5 = vmul.f32 %v1499_v1, %v1499_v1 }
 0x122   : > { %638 = vadd.xlane.f32.xlu1 %v621_v5 }
 0x126   : > { %594 = vadd.xlane.f32.xlu1 %v1505_v6 }
 0x12a   : > { %630 = vadd.xlane.f32.xlu1 %v617_v7 }
 0x12e   : > { %598 = vadd.xlane.f32.xlu1 %v1510_v8 }
 0x132   : > { %634 = vadd.xlane.f32.xlu1 %v619_v9 }
 0x136   : > { %636 = vadd.xlane.f32.xlu1 %v620_v13 }
 0x18b   : > { %v587_v20 = vpop.xlane.xlu0 %586 }
 0x18c   : > { %v604_v29 = vmul.f32 0.03125, %v587_v20 }
 0x18e   : > { %v649_v35 = vmul.f32 %v604_v29, %v604_v29  ;;  %v676_v18 = vsub.f32 %v1472_v38, %v604_v29 }
 0x18f   : > { %v589_v21 = vpop.xlane.xlu0 %588  ;;  %v625_v22 = vpop.xlane.xlu1 %624 }
 0x190   : > { %v605_v27 = vmul.f32 0.03125, %v589_v21  ;;  %v641_v37 = vmul.f32 0.03125, %v625_v22 }
 0x192   : > { %v650_v33 = vmul.f32 %v605_v27, %v605_v27 }
 0x193   : > { %v623_v23 = vpop.xlane.xlu0 %622  ;;  %v591_v24 = vpop.xlane.xlu1 %590 }
 0x194   : > { %v606_v26 = vmul.f32 0.03125, %v591_v24  ;;  %v640_v32 = vmul.f32 0.03125, %v623_v23  ;;  %v659_v40 = vsub.f32 %v641_v37, %v650_v33 }
 0x196   : > { %v651_v31 = vmul.f32 %v606_v26, %v606_v26  ;;  %v658_v39 = vsub.f32 %v640_v32, %v649_v35  ;;  %v668_v48 = vmax.f32 %v659_v40, 0.0  ;;  %v678_v15 = vsub.f32 %v1480_v45, %v606_v26  ;;  %v1573_v45 = vld [vmem:[%s1655_s3] ss:$0 sm:$0xff] }
 0x197   : > { %v627_v25 = vpop.xlane.xlu0 %626  ;;  %v1587_v40 = vld [vmem:[%s1656_s4] ss:$0 sm:$0xff] }
 0x198   : > { %v642_v28 = vmul.f32 0.03125, %v627_v25  ;;  %v667_v47 = vmax.f32 %v658_v39, 0.0  ;;  %v686_v55 = vadd.f32 1e-05, %v668_v48  ;;  %v677_v25 = vsub.f32 %v1474_v41, %v605_v27 }
 0x19a   : > { %v660_v34 = vsub.f32 %v642_v28, %v651_v31  ;;  %v685_v53 = vadd.f32 1e-05, %v667_v47 }
 0x19b   : > { %v593_v30 = vpop.xlane.xlu0 %592 }
 0x19c   : > { %v669_v42 = vmax.f32 %v660_v34, 0.0  ;;  %v1555_v43 = vmul.f32 0.03125, %v593_v30 }
 0x19e   : > { %v687_v49 = vadd.f32 1e-05, %v669_v42  ;;  %v652_v50 = vmul.f32 %v1555_v43, %v1555_v43 }
 0x19f   : > { %v629_v36 = vpop.xlane.xlu0 %628 }
 0x1a0   : > { %v643_v46 = vmul.f32 0.03125, %v629_v36  ;;  %1293 = vrsqrt.f32 %v687_v49  ;;  %v679_v36 = vsub.f32 %v1487_v52, %v1555_v43 }
 0x1a1   : > { %1295 = vrsqrt.f32 %v685_v53 }
 0x1a2   : > { %v661_v51 = vsub.f32 %v643_v46, %v652_v50  ;;  %1297 = vrsqrt.f32 %v686_v55 }
 0x1a3   : > { %v597_v44 = vpop.xlane.xlu0 %596 }
 0x1a4   : > { %v1559_v56 = vmul.f32 0.03125, %v597_v44  ;;  %v670_v59 = vmax.f32 %v661_v51, 0.0 }
 0x1a6   : > { %v654_v62 = vmul.f32 %v1559_v56, %v1559_v56  ;;  %v688_v2 = vadd.f32 1e-05, %v670_v59 }
 0x1a7   : > { %v633_v54 = vpop.xlane.xlu0 %632 }
 0x1a8   : > { %v645_v60 = vmul.f32 0.03125, %v633_v54  ;;  %1299 = vrsqrt.f32 %v688_v2 }
 0x1aa   : > { %v663_v3 = vsub.f32 %v645_v60, %v654_v62  ;;  %v1294_v10 = vpop.eup %1293 }
 0x1ab   : > { %v603_v57 = vpop.xlane.xlu1 %602  ;;  %v1296_v17 = vpop.eup %1295  ;;  %v705_v19 = vmul.f32 %v1294_v10, %v678_v15 }
 0x1ac   : > { %v612_v61 = vmul.f32 0.03125, %v603_v57  ;;  %v672_v12 = vmax.f32 %v663_v3, 0.0  ;;  %v1298_v21 = vpop.eup %1297  ;;  %v703_v28 = vmul.f32 %v1296_v17, %v676_v18  ;;  %v601_v31 = vpop.xlane.xlu0 %600  ;;  %v681_v3 = vsub.f32 %v1492_v58, %v1559_v56 }
 0x1ad   : > { %v704_v26 = vmul.f32 %v1298_v21, %v677_v25  ;;  %v721_v29 = vmul.f32 %v1573_v45, %v705_v19  ;;  %v1582_v37 = vmul.f32 0.03125, %v601_v31 }
 0x1ae   : > { %v657_v4 = vmul.f32 %v612_v61, %v612_v61  ;;  %v690_v22 = vadd.f32 1e-05, %v672_v12  ;;  %v719_v35 = vmul.f32 %v1573_v45, %v703_v28  ;;  %v684_v47 = vsub.f32 %v1499_v1, %v612_v61 }
 0x1af   : > { %v639_v63 = vpop.xlane.xlu1 %638  ;;  %v720_v27 = vmul.f32 %v1573_v45, %v704_v26  ;;  %v737_v46 = vadd.f32 %v1587_v40, %v721_v29  ;;  %v656_v54 = vmul.f32 %v1582_v37, %v1582_v37 }
 0x1b0   : > { %v648_v5 = vmul.f32 0.03125, %v639_v63  ;;  %v735_v43 = vadd.f32 %v1587_v40, %v719_v35 }
 0x1b1   : > { %v736_v53 = vadd.f32 %v1587_v40, %v720_v27  ;;  %v746_v59 = vmax.f32 %v737_v46, 0.0 }
 0x1b2   : > { %v666_v7 = vsub.f32 %v648_v5, %v657_v4  ;;  %v1300_v34 = vpop.eup %1299  ;;  %v744_v2 = vmax.f32 %v735_v43, 0.0 }
 0x1b3   : > { %v595_v9 = vpop.xlane.xlu1 %594  ;;  %v706_v48 = vmul.f32 %v1300_v34, %v679_v36  ;;  %v745_v5 = vmax.f32 %v736_v53, 0.0 }
 0x1b4   : > { %v675_v13 = vmax.f32 %v666_v7, 0.0  ;;  %v1563_v14 = vmul.f32 0.03125, %v595_v9  ;;  %v1148_v9 = vpack.c.bf16 %v746_v59, %v746_v59  ;;  %v1146_v18 = vpack.c.bf16 %v744_v2, %v744_v2 }
 0x1b5   : > { %v722_v62 = vmul.f32 %v1573_v45, %v706_v48  ;;  %v1147_v19 = vpack.c.bf16 %v745_v5, %v745_v5 }
 0x1b6   : > { %v693_v16 = vadd.f32 1e-05, %v675_v13  ;;  %v653_v23 = vmul.f32 %v1563_v14, %v1563_v14  ;;  %v680_v10 = vsub.f32 %v1505_v6, %v1563_v14  ;;  %v791_v58 = vadd.bf16 %v1148_v9, %v1146_v18 }
 0x1b7   : > { %v631_v20 = vpop.xlane.xlu1 %630  ;;  %v738_v13 = vadd.f32 %v1587_v40, %v722_v62 }
 0x1b8   : > { %1301 = vrsqrt.f32 %v693_v16  ;;  %v644_v24 = vmul.f32 0.03125, %v631_v20 }
 0x1b9   : > { %1303 = vrsqrt.f32 %v690_v22 }
 0x1ba   : > { %v662_v30 = vsub.f32 %v644_v24, %v653_v23  ;;  %v747_v23 = vmax.f32 %v738_v13, 0.0 }
 0x1bb   : > { %v599_v38 = vpop.xlane.xlu1 %598 }
 0x1bc   : > { %v671_v32 = vmax.f32 %v662_v30, 0.0  ;;  %v1576_v33 = vmul.f32 0.03125, %v599_v38  ;;  %v1149_v30 = vpack.c.bf16 %v747_v23, %v747_v23 }
 0x1be   : > { %v689_v41 = vadd.f32 1e-05, %v671_v32  ;;  %v655_v42 = vmul.f32 %v1576_v33, %v1576_v33  ;;  %v682_v14 = vsub.f32 %v1510_v8, %v1576_v33  ;;  %v683_v32 = vsub.f32 %v1497_v0, %v1582_v37 }
 0x1bf   : > { %v635_v39 = vpop.xlane.xlu1 %634  ;;  %v792_v34 = vadd.bf16 %v1149_v30, %v1147_v19 }
 0x1c0   : > { %1305 = vrsqrt.f32 %v689_v41  ;;  %v646_v44 = vmul.f32 0.03125, %v635_v39 }
 0x1c2   : > { %v1302_v49 = vpop.eup %1301  ;;  %v664_v52 = vsub.f32 %v646_v44, %v655_v42 }
 0x1c3   : > { %v711_v50 = vmul.f32 %v1302_v49, %v684_v47  ;;  %v637_v51 = vpop.xlane.xlu1 %636  ;;  %v1304_v1 = vpop.eup %1303 }
 0x1c4   : > { %v673_v55 = vmax.f32 %v664_v52, 0.0  ;;  %v647_v57 = vmul.f32 0.03125, %v637_v51  ;;  %v708_v15 = vmul.f32 %v1304_v1, %v681_v3 }
 0x1c5   : > { %v727_v60 = vmul.f32 %v1573_v45, %v711_v50 }
 0x1c6   : > { %v691_v61 = vadd.f32 1e-05, %v673_v55  ;;  %v665_v63 = vsub.f32 %v647_v57, %v656_v54  ;;  %v724_v24 = vmul.f32 %v1573_v45, %v708_v15 }
 0x1c7   : > { %v743_v4 = vadd.f32 %v1587_v40, %v727_v60 }
 0x1c8   : > { %1307 = vrsqrt.f32 %v691_v61  ;;  %v674_v7 = vmax.f32 %v665_v63, 0.0  ;;  %v740_v26 = vadd.f32 %v1587_v40, %v724_v24 }
 0x1c9   : > { %v752_v12 = vmax.f32 %v743_v4, 0.0 }
 0x1ca   : > { %v1306_v16 = vpop.eup %1305  ;;  %v692_v17 = vadd.f32 1e-05, %v674_v7  ;;  %v749_v27 = vmax.f32 %v740_v26, 0.0 }
 0x1cb   : > { %v1154_v20 = vpack.c.bf16 %v752_v12, %v752_v12  ;;  %v707_v21 = vmul.f32 %v1306_v16, %v680_v10 }
 0x1cc   : > { %1309 = vrsqrt.f32 %v692_v17  ;;  %v1151_v44 = vpack.c.bf16 %v749_v27, %v749_v27 }
 0x1cd   : > { %v790_v56 = vadd.bf16 %v1154_v20, %v1147_v19  ;;  %v723_v22 = vmul.f32 %v1573_v45, %v707_v21  ;;  %v1027_v19 = vld [vmem:[#allocation2] sm:$0x1] }
 0x1ce   : > { %v794_v37 = vadd.bf16 %v1151_v44, %v1149_v30  ;;  %v1140_v30 = vld [vmem:[%s1659_s7] ss:$0 sm:$0xff] }
 0x1cf   : > { %v1127_v25 = vcombine.low %v790_v56, %v791_v58  ;;  %v739_v6 = vadd.f32 %v1587_v40, %v723_v22 }
 0x1d1   : > { %1217 = vmatmul.mubr.bf16.vlgmr.msra.gmra.mrb[20].mxu0 %v1127_v25  ;;  %v748_v28 = vmax.f32 %v739_v6, 0.0 }
 0x1d2   : > { %v1308_v38 = vpop.eup %1307 }
 0x1d3   : > { %v1150_v29 = vpack.c.bf16 %v748_v28, %v748_v28  ;;  %v709_v31 = vmul.f32 %v1308_v38, %v682_v14  ;;  %v1141_v38 = vld [vmem:[%s1660_s8] ss:$0 sm:$0xff] }
 0x1d5   : > { %v793_v35 = vadd.bf16 %v1150_v29, %v1148_v9  ;;  %v725_v41 = vmul.f32 %v1573_v45, %v709_v31 }
 0x1d6   : > { %v1310_v36 = vpop.eup %1309 }
 0x1d7   : > { %v1128_v39 = vcombine.low %v792_v34, %v793_v35  ;;  %v741_v8 = vadd.f32 %v1587_v40, %v725_v41  ;;  %v710_v33 = vmul.f32 %v1310_v36, %v683_v32  ;;  %v1143_v35 = vld [vmem:[%s1661_s9] ss:$0 sm:$0xff]  ;;  %v1033_v36 = vlaneseq }
 0x1d9   : > { %1221 = vmatmul.mubr.bf16.vlgmr.msra.gmra.mrb[0].mxu1 %v1128_v39  ;;  %v750_v42 = vmax.f32 %v741_v8, 0.0  ;;  %v726_v46 = vmul.f32 %v1573_v45, %v710_v33  ;;  %v1034_v39 = vshrl.u32 %v1033_v36, 7 }
 0x1da   : > { %1224 = vmatprep.mubr.msk.bf16.mxu1 %vm1338_vm0, %v1337_v11 }
 0x1db   : > { %v1152_v47 = vpack.c.bf16 %v750_v42, %v750_v42  ;;  %v742_v0 = vadd.f32 %v1587_v40, %v726_v46  ;;  %v1126_v40 = vld [vmem:[%s1658_s6] ss:$0 sm:$0xff]  ;;  %v1035_v8 = vsub.s32 0, %v1034_v39  ;;  %v1040_v42 = vand.u32 127, %v1033_v36 }
 0x1dd   : > { %v795_v48 = vadd.bf16 %v1152_v47, %v1150_v29  ;;  %v751_v49 = vmax.f32 %v742_v0, 0.0  ;;  %v797_v51 = vadd.bf16 %v1154_v20, %v1152_v47  ;;  %v1339_v20 = vmov 0  }
 0x1de   : > { %1281 = vset.pattern.permute.xlu1 %v1339_v20  ;;  %1282 = vset.pattern.permute.xlu0 %v1339_v20  ;;  %v1043_v46 = vsub.s32 %v1040_v42, %v1034_v39 }
 0x1df   : > { %v1129_v52 = vcombine.low %v794_v37, %v795_v48  ;;  %v1153_v43 = vpack.c.bf16 %v751_v49, %v751_v49 }
 0x1e1   : > { %1225 = vmatmul.mubr.bf16.gmra.mrb[4].mxu1 %v1129_v52  ;;  %v796_v50 = vadd.bf16 %v1153_v43, %v1151_v44  ;;  %v798_v45 = vadd.bf16 %v1153_v43, %v1146_v18 }
 0x1e2   : > { %1228 = vmatprep.mubr.msk.bf16.mxu1 %vm1338_vm0, %v1337_v11 }
 0x1e3   : > { %v1130_v53 = vcombine.low %v796_v50, %v797_v51  ;;  %v1131_v54 = vcombine.low %v798_v45, %v798_v45 }
 0x1e9   : > { %1229 = vmatmul.mubr.bf16.gmra.mrb[8].mxu1 %v1130_v53 }
 0x1ea   : > { %1232 = vmatprep.mubr.msk.bf16.mxu1 %vm1338_vm0, %v1337_v11 }
 0x1f1   : > { %1233 = vmatmul.mubr.bf16.gmra.mrb[12].mxu1 %v1131_v54 }
 0x2a4   : > { %v932_v55 = vpop.f32.mrb[20].mxu0 }
 0x2a5   : > { %v933_v57 = vadd.f32 %v1126_v40, %v932_v55  ;;  %v1218_v59 = vpop.f32.mrb[21].mxu0 }
 0x2a6   : > { %v935_v60 = vpop.f32.mrb[22].mxu0 }
 0x2a7   : > { %963 = vadd.xlane.f32.xlu0 %v933_v57  ;;  %v1219_v62 = vpop.f32.mrb[23].mxu0  ;;  %v969_v1 = vmul.f32 %v933_v57, %v933_v57 }
 0x2a9   : > { %971 = vadd.xlane.f32.xlu1 %v969_v1 }
 0x2ac   : > { %v940_v61 = vpop.f32.mrb[0].mxu1 }
 0x2ad   : > { %v1222_v63 = vpop.f32.mrb[1].mxu1 }
 0x2ae   : > { %v942_v2 = vpop.f32.mrb[2].mxu1 }
 0x2af   : > { %v1223_v3 = vpop.f32.mrb[3].mxu1 }
 0x2b4   : > { %v946_v11 = vpop.f32.mrb[4].mxu1 }
 0x2b5   : > { %v1226_v4 = vpop.f32.mrb[5].mxu1 }
 0x2b6   : > { %v948_v5 = vpop.f32.mrb[6].mxu1 }
 0x2b7   : > { %v1227_v7 = vpop.f32.mrb[7].mxu1 }
 0x2ba   : > { %1030 = vperm.xlu1 %1281, %v1027_v19  }
 0x2bc   : > { %v952_v9 = vpop.f32.mrb[8].mxu1 }
 0x2bd   : > { %v1230_v10 = vpop.f32.mrb[9].mxu1 }
 0x2be   : > { %v954_v12 = vpop.f32.mrb[10].mxu1 }
 0x2bf   : > { %v1231_v13 = vpop.f32.mrb[11].mxu1 }
 0x2c4   : > { %v958_v15 = vpop.f32.mrb[12].mxu1 }
 0x2c5   : > { %v1234_v16 = vpop.f32.mrb[13].mxu1 }
 0x2c6   : > { %v960_v17 = vpop.f32.mrb[14].mxu1 }
 0x2c7   : > { %v1235_v18 = vpop.f32.mrb[15].mxu1 }
 0x334   : > { %v964_v21 = vpop.xlane.xlu0 %963 }
 0x335   : > { %v967_v58 = vmul.f32 0.03125, %v964_v21 }
 0x336   : > { %v972_v56 = vpop.xlane.xlu1 %971 }
 0x337   : > { %v977_v22 = vmul.f32 %v967_v58, %v967_v58  ;;  %v975_v23 = vmul.f32 0.03125, %v972_v56  ;;  %v983_v14 = vsub.f32 %v933_v57, %v967_v58 }
 0x339   : > { %v979_v24 = vsub.f32 %v975_v23, %v977_v22 }
 0x33a   : > { %v1031_v33 = vpop.permute.xlu1 %1030 }
 0x33b   : > { %v981_v25 = vmax.f32 %v979_v24, 0.0  ;;  %v1036_v44 = vrot.slane %v1031_v33, %v1035_v8 }
 0x33d   : > { %v985_v6 = vadd.f32 1e-05, %v981_v25 }
 0x33f   : > { %1311 = vrsqrt.f32 %v985_v6 }
 0x349   : > { %v1312_v28 = vpop.eup %1311 }
 0x34a   : > { %v989_v26 = vmul.f32 %v1312_v28, %v983_v14 }
 0x34c   : > { %v998_v29 = vmul.f32 %v1140_v30, %v989_v26 }
 0x34e   : > { %v1007_v31 = vadd.f32 %v1141_v38, %v998_v29 }
 0x350   : > { %v1009_v32 = vmax.f32 %v1007_v31, 0.0 }
 0x352   : > { %v1155_v34 = vpack.c.bf16 %v1009_v32, %v1009_v32 }
 0x354   : > { %v1016_v41 = vunpack.c.l.bf16 %v1155_v34 }
 0x356   : > { %v1024_v27 = vmul.f32 %v1143_v35, %v1016_v41 }
 0x358   : > { %1025 = vadd.xlane.f32.xlu0 %v1024_v27 }
 0x3e5   : > { %v1026_v47 = vpop.xlane.xlu0 %1025 }
 0x3e6   : > { %v1037_v0 = vadd.f32 %v1036_v44, %v1026_v47 }
 0x3e8   : > { %v1044_v37 = vrot.slane %v1037_v0, %v1043_v46 }
 0x3ea   : > { %1047 = vst.msk [vmem:[%s450_s27] sm:$0x1] %vm1046_vm2, %v1044_v37 }
 0x3eb PF: > { %p20_p9 = scmp.ge.s32.totalorder %s1420_s22, 4   ;;  %s1664_s19 = smov %s1331_s20 }
 0x3ec   : > { %s1665_s20 = smov %s1429_s25  ;;  %s1666_s21 = smov %s1420_s22 }
 0x3ed   :  { %22 = sbr.rel (!%p20_p9) target bundleno = 5 (0x5), region = 137 }

</bundles_post_ra>
